<compile_context>
chip_gen: v6e
topology: v6e:2x2x1
jax: 0.10.0
libtpu: 0.0.40
codegen_flags: <defaults>
</compile_context>

<pallas_src>
import jax
import jax.numpy as jnp
from jax.experimental import pallas as pl
from jax.experimental.pallas import tpu as pltpu


def joint_kernel(encp_ref, decp_ref, w2_ref, b2_ref, out_ref, hid_ref):
    # encp_ref: (1, tT, H) f32   -- enc @ W1[:E] + b1  (precomputed in XLA)
    # decp_ref: (1, tU, H) f32   -- dec @ W1[E:]       (precomputed in XLA)
    # w2_ref  : (H, tV) bf16     b2_ref: (1, tV) f32
    # out_ref : (1, tT, tU, tV)  hid_ref: (tT*tU, H) bf16 VMEM scratch
    tT = encp_ref.shape[1]
    tU = decp_ref.shape[1]
    H = w2_ref.shape[0]
    tV = w2_ref.shape[1]

    # Hidden-tile cache: ONLY correct because V is the innermost, sequentially
    # iterated ("arbitrary") grid axis and VMEM scratch persists across grid
    # steps -- do not reorder the grid or mark the V axis "parallel".
    @pl.when(pl.program_id(3) == 0)
    def _():
        enc_proj = encp_ref[0]                      # (tT, H) f32
        dec_proj = decp_ref[0]                      # (tU, H) f32
        # Chunk over tT rows so the f32 broadcast-add/tanh transient stays
        # (chunk, tU, H) instead of (tT, tU, H) (VMEM/vreg headroom on v7x).
        chunk = 8 if tT % 8 == 0 else tT
        for r0 in range(0, tT, chunk):
            h = jnp.tanh(enc_proj[r0:r0 + chunk, None, :]
                         + dec_proj[None, :, :])    # (chunk, tU, H) f32
            hid_ref[pl.ds(r0 * tU, chunk * tU), :] = (
                h.reshape(chunk * tU, H).astype(hid_ref.dtype))

    # Vocab projection: one flat MXU matmul per (b, t, u, v) grid step.
    logits = jnp.dot(hid_ref[...], w2_ref[...],
                     preferred_element_type=jnp.float32)        # (tT*tU, tV)
    logits = logits + b2_ref[0]
    out_ref[0] = logits.reshape(tT, tU, tV).astype(out_ref.dtype)


def joint_net(enc_state, dec_state, params, *, block_t=32, block_u=32,
              block_v=512, out_dtype=jnp.bfloat16):
    """enc_state: (B, T, E)  dec_state: (B, U, D)  -> (B, T, U, V)."""
    w1, b1, w2, b2 = params["w1"], params["b1"], params["w2"], params["b2"]
    B, T, E = enc_state.shape
    _, U, D = dec_state.shape
    H = w1.shape[1]
    V = w2.shape[1]
    assert w1.shape[0] == E + D
    # H is the lane/contraction dim of the in-kernel matmul; keep it 128-aligned.
    assert H % 128 == 0, "inner_dim must be a multiple of 128"

    def ceil_to(x, m):
        return -(-x // m) * m

    # Clamp the shipped (32, 32, 512) defaults down to the (padded) problem so
    # small inputs don't pay for huge pad tiles.
    block_t = min(block_t, ceil_to(T, 8))
    block_u = min(block_u, ceil_to(U, 8))
    block_v = min(block_v, ceil_to(V, 128))
    # Tiling constraints: sublane (8) on tT/tU, lane (128) on tV.
    assert block_t % 8 == 0 and block_u % 8 == 0 and block_v % 128 == 0

    Tp, Up, Vp = ceil_to(T, block_t), ceil_to(U, block_u), ceil_to(V, block_v)
    n_t, n_u, n_v = Tp // block_t, Up // block_u, Vp // block_v

    # ---- First layer hoisted to XLA (f32), b1 folded into enc_proj. ----
    w1e = w1[:E].astype(jnp.float32)                              # (E, H)
    w1d = w1[E:].astype(jnp.float32)                              # (D, H)
    enc_proj = enc_state.astype(jnp.float32) @ w1e + b1.astype(jnp.float32)
    dec_proj = dec_state.astype(jnp.float32) @ w1d                # (B, U, H)

    # Pad T / U / V up to tile multiples (padded rows/cols sliced off below).
    enc_proj = jnp.pad(enc_proj, ((0, 0), (0, Tp - T), (0, 0)))
    dec_proj = jnp.pad(dec_proj, ((0, 0), (0, Up - U), (0, 0)))
    w2_p = jnp.pad(w2, ((0, 0), (0, Vp - V))).astype(jnp.bfloat16)       # (H, Vp)
    b2_2d = jnp.pad(b2, ((0, Vp - V),)).reshape(1, Vp).astype(jnp.float32)

    grid = (B, n_t, n_u, n_v)

    # Advisory cost estimate (counts the W2 restream per (b,t,u) tile and the
    # dec_proj restream per T tile).
    out_bytes = B * Tp * Up * Vp * jnp.dtype(out_dtype).itemsize
    w2_sweeps = (B * n_t * n_u) if n_v > 1 else 1
    flops = 2 * B * Tp * Up * H * Vp
    transcendentals = B * Tp * Up * H
    bytes_accessed = (enc_proj.size * 4
                      + dec_proj.size * 4 * n_t
                      + w2_p.size * 2 * w2_sweeps
                      + b2_2d.size * 4 * w2_sweeps
                      + out_bytes)

    out_padded = pl.pallas_call(
        joint_kernel,
        out_shape=jax.ShapeDtypeStruct((B, Tp, Up, Vp), out_dtype),
        grid_spec=pltpu.PrefetchScalarGridSpec(
            num_scalar_prefetch=0,
            grid=grid,
            in_specs=[
                pl.BlockSpec((1, block_t, H), lambda b, t, u, v: (b, t, 0)),
                pl.BlockSpec((1, block_u, H), lambda b, t, u, v: (b, u, 0)),
                # W2 is the only large streamed input; bump to pl.Buffered(3)
                # only if a trace shows exposed DMA at the sweep restart.
                pl.BlockSpec((H, block_v), lambda b, t, u, v: (0, v)),
                pl.BlockSpec((1, block_v), lambda b, t, u, v: (0, v)),
            ],
            out_specs=pl.BlockSpec((1, block_t, block_u, block_v),
                                   lambda b, t, u, v: (b, t, u, v)),
            scratch_shapes=[pltpu.VMEM((block_t * block_u, H), jnp.bfloat16)],
        ),
        compiler_params=pltpu.CompilerParams(
            # V must stay the sequential innermost axis (scratch cache).
            dimension_semantics=("parallel", "parallel", "parallel", "arbitrary"),
            # Footprint at default tiles (H<=1024) is ~10-16 MiB; 48 MiB keeps
            # headroom for 2-deep pipelining and fits v7x's 64 MiB VMEM.
            vmem_limit_bytes=48 * 1024 * 1024,
        ),
        cost_estimate=pl.CostEstimate(
            flops=flops,
            transcendentals=transcendentals,
            bytes_accessed=bytes_accessed,
        ),
    )(enc_proj, dec_proj, w2_p, b2_2d)

    return out_padded[:, :T, :U, :V]


def init_params(key, input_size, inner_dim, vocab_size):
    k1, k2, k3, k4 = jax.random.split(key, 4)
    s1 = 1.0 / jnp.sqrt(input_size)
    s2 = 1.0 / jnp.sqrt(inner_dim)
    return {
        "w1": jax.random.uniform(k1, (input_size, inner_dim), jnp.float32, -s1, s1),
        "b1": jax.random.uniform(k2, (inner_dim,), jnp.float32, -s1, s1),
        "w2": jax.random.uniform(k3, (inner_dim, vocab_size), jnp.float32, -s2, s2),
        "b2": jax.random.uniform(k4, (vocab_size,), jnp.float32, -s2, s2),
    }


def joint_net_ref(enc_state, dec_state, params):
    """Pure-JAX f32 reference mirroring the PyTorch forward exactly."""
    B, T, E = enc_state.shape
    _, U, D = dec_state.shape
    enc = jnp.broadcast_to(enc_state[:, :, None, :], (B, T, U, E))
    dec = jnp.broadcast_to(dec_state[:, None, :, :], (B, T, U, D))
    concat = jnp.concatenate([enc, dec], axis=-1)
    h = jnp.tanh(concat @ params["w1"] + params["b1"])
    return h @ params["w2"] + params["b2"]


if __name__ == "__main__":
    # Small but hardware-shaped test: lane-dense feature dims; run once with
    # the shipped defaults (bf16 output) and once with small tiles so the
    # multi-V-tile hidden-cache path is exercised.
    B, T, U, E, D = 2, 16, 16, 128, 128
    input_size, inner_dim, vocab_size = E + D, 128, 256

    key = jax.random.PRNGKey(0)
    k_enc, k_dec, k_params = jax.random.split(key, 3)
    enc_state = jax.random.normal(k_enc, (B, T, E), jnp.float32)
    dec_state = jax.random.normal(k_dec, (B, U, D), jnp.float32)
    params = init_params(k_params, input_size, inner_dim, vocab_size)

    ref = joint_net_ref(enc_state, dec_state, params)

    # 1) Shipped defaults (tiles clamp to the small problem), bf16 output.
    out_bf16 = joint_net(enc_state, dec_state, params)
    out_bf16 = jax.block_until_ready(out_bf16)
    assert out_bf16.shape == (B, T, U, vocab_size)
    assert out_bf16.dtype == jnp.bfloat16
    assert jnp.allclose(out_bf16.astype(jnp.float32), ref, atol=1e-1, rtol=1e-1), \
        "bf16-output mismatch vs reference"

    # 2) Small tiles -> several V tiles per (b,t,u) tile, f32 output for a
    #    tighter parity check (only the vocab matmul runs in bf16 on the MXU).
    out_f32 = joint_net(enc_state, dec_state, params, block_t=8, block_u=8,
                        block_v=128, out_dtype=jnp.float32)
    out_f32 = jax.block_until_ready(out_f32)
    assert out_f32.shape == (B, T, U, vocab_size)
    assert jnp.allclose(out_f32, ref, atol=5e-2, rtol=5e-2), "mismatch vs reference"
    assert jnp.mean(jnp.abs(out_f32 - ref)) < 1e-2, "mean error too large vs reference"

    print("KERNEL_OK")
</pallas_src>

<mosaic_0001>
module attributes {stable_mosaic.version = 11 : i64} {
  func.func @joint_kernel(%arg0: i32, %arg1: i32, %arg2: i32, %arg3: i32, %arg4: memref<1x16x128xf32, #tpu.memory_space<vmem>>, %arg5: memref<1x16x128xf32, #tpu.memory_space<vmem>>, %arg6: memref<128x256xbf16, #tpu.memory_space<vmem>>, %arg7: memref<1x256xf32, #tpu.memory_space<vmem>>, %arg8: memref<1x16x16x256xbf16, #tpu.memory_space<vmem>>, %arg9: memref<256x128xbf16, #tpu.memory_space<vmem>>) attributes {dimension_semantics = [#tpu.dimension_semantics<parallel>, #tpu.dimension_semantics<parallel>, #tpu.dimension_semantics<parallel>, #tpu.dimension_semantics<arbitrary>], iteration_bounds = array<i64: 2, 1, 1, 1>, scalar_prefetch = 0 : i64, scratch_operands = 1 : i64, tpu.core_type = #tpu.core_type<tc>, window_params = [{transform_indices = @transform_0, window_bounds = array<i64: 1, 16, 128>}, {transform_indices = @transform_1, window_bounds = array<i64: 1, 16, 128>}, {transform_indices = @transform_2, window_bounds = array<i64: 128, 256>}, {transform_indices = @transform_3, window_bounds = array<i64: 1, 256>}, {transform_indices = @transform_4, window_bounds = array<i64: 1, 16, 16, 256>}]} {
    %c0_i32 = arith.constant 0 : i32
    %0 = arith.cmpi eq, %arg3, %c0_i32 : i32
    %1 = arith.extui %0 : i1 to i32
    %c0_i32_0 = arith.constant 0 : i32
    %2 = arith.cmpi ne, %1, %c0_i32_0 : i32
    scf.if %2 {
      %c0_10 = arith.constant 0 : index
      %c0_11 = arith.constant 0 : index
      %c0_12 = arith.constant 0 : index
      %16 = vector.load %arg4[%c0_10, %c0_11, %c0_12] : memref<1x16x128xf32, #tpu.memory_space<vmem>>, vector<1x16x128xf32>
      %17 = vector.shape_cast %16 : vector<1x16x128xf32> to vector<16x128xf32>
      %c0_13 = arith.constant 0 : index
      %c0_14 = arith.constant 0 : index
      %c0_15 = arith.constant 0 : index
      %18 = vector.load %arg5[%c0_13, %c0_14, %c0_15] : memref<1x16x128xf32, #tpu.memory_space<vmem>>, vector<1x16x128xf32>
      %19 = vector.shape_cast %18 : vector<1x16x128xf32> to vector<16x128xf32>
      %20 = vector.extract_strided_slice %17 {offsets = [0, 0], sizes = [8, 128], strides = [1, 1]} : vector<16x128xf32> to vector<8x128xf32>
      %21 = vector.shape_cast %20 : vector<8x128xf32> to vector<8x1x128xf32>
      %22 = vector.shape_cast %19 : vector<16x128xf32> to vector<1x16x128xf32>
      %23 = vector.broadcast %21 : vector<8x1x128xf32> to vector<8x16x128xf32>
      %24 = vector.broadcast %22 : vector<1x16x128xf32> to vector<8x16x128xf32>
      %25 = arith.addf %23, %24 : vector<8x16x128xf32>
      %26 = math.tanh %25 : vector<8x16x128xf32>
      %27 = vector.shape_cast %26 : vector<8x16x128xf32> to vector<128x128xf32>
      %28 = arith.truncf %27 : vector<128x128xf32> to vector<128x128xbf16>
      %c0_16 = arith.constant 0 : index
      %c0_17 = arith.constant 0 : index
      %29 = vector.load %arg9[%c0_16, %c0_17] : memref<256x128xbf16, #tpu.memory_space<vmem>>, vector<128x128xbf16>
      tpu.vector_store %arg9[%c0_16, %c0_17], %28 {strides = array<i32>} : memref<256x128xbf16, #tpu.memory_space<vmem>>, vector<128x128xbf16>,
      %30 = vector.extract_strided_slice %17 {offsets = [8, 0], sizes = [8, 128], strides = [1, 1]} : vector<16x128xf32> to vector<8x128xf32>
      %31 = vector.shape_cast %30 : vector<8x128xf32> to vector<8x1x128xf32>
      %32 = vector.shape_cast %19 : vector<16x128xf32> to vector<1x16x128xf32>
      %33 = vector.broadcast %31 : vector<8x1x128xf32> to vector<8x16x128xf32>
      %34 = vector.broadcast %32 : vector<1x16x128xf32> to vector<8x16x128xf32>
      %35 = arith.addf %33, %34 : vector<8x16x128xf32>
      %36 = math.tanh %35 : vector<8x16x128xf32>
      %37 = vector.shape_cast %36 : vector<8x16x128xf32> to vector<128x128xf32>
      %38 = arith.truncf %37 : vector<128x128xf32> to vector<128x128xbf16>
      %c128 = arith.constant 128 : index
      %c0_18 = arith.constant 0 : index
      %39 = vector.load %arg9[%c128, %c0_18] : memref<256x128xbf16, #tpu.memory_space<vmem>>, vector<128x128xbf16>
      tpu.vector_store %arg9[%c128, %c0_18], %38 {strides = array<i32>} : memref<256x128xbf16, #tpu.memory_space<vmem>>, vector<128x128xbf16>,
    } else {
    }
    %c0 = arith.constant 0 : index
    %c0_1 = arith.constant 0 : index
    %3 = vector.load %arg9[%c0, %c0_1] : memref<256x128xbf16, #tpu.memory_space<vmem>>, vector<256x128xbf16>
    %c0_2 = arith.constant 0 : index
    %c0_3 = arith.constant 0 : index
    %4 = vector.load %arg6[%c0_2, %c0_3] : memref<128x256xbf16, #tpu.memory_space<vmem>>, vector<128x256xbf16>
    %cst = arith.constant dense<0.000000e+00> : vector<256x256xf32>
    %5 = tpu.matmul %3, %4, %cst {dimension_numbers = #tpu.dot_dimension_numbers<[1], [0], [0], [1], [0, 0, 1, 1], [], []>} : vector<256x128xbf16>, vector<128x256xbf16>, vector<256x256xf32> -> vector<256x256xf32>
    %c0_4 = arith.constant 0 : index
    %c0_5 = arith.constant 0 : index
    %6 = vector.load %arg7[%c0_4, %c0_5] : memref<1x256xf32, #tpu.memory_space<vmem>>, vector<1x256xf32>
    %7 = vector.shape_cast %6 : vector<1x256xf32> to vector<256xf32>
    %8 = vector.shape_cast %7 : vector<256xf32> to vector<1x256xf32>
    %9 = vector.broadcast %8 : vector<1x256xf32> to vector<256x256xf32>
    %10 = arith.addf %5, %9 : vector<256x256xf32>
    %11 = vector.shape_cast %10 : vector<256x256xf32> to vector<16x16x256xf32>
    %12 = arith.truncf %11 : vector<16x16x256xf32> to vector<16x16x256xbf16>
    %c0_6 = arith.constant 0 : index
    %c0_7 = arith.constant 0 : index
    %c0_8 = arith.constant 0 : index
    %c0_9 = arith.constant 0 : index
    %13 = vector.load %arg8[%c0_6, %c0_7, %c0_8, %c0_9] : memref<1x16x16x256xbf16, #tpu.memory_space<vmem>>, vector<1x16x16x256xbf16>
    %14 = vector.shape_cast %13 : vector<1x16x16x256xbf16> to vector<16x16x256xbf16>
    %15 = vector.shape_cast %12 : vector<16x16x256xbf16> to vector<1x16x16x256xbf16>
    tpu.vector_store %arg8[%c0_6, %c0_7, %c0_8, %c0_9], %15 {strides = array<i32>} : memref<1x16x16x256xbf16, #tpu.memory_space<vmem>>, vector<1x16x16x256xbf16>,
    return
  }
  func.func @transform_0(%arg0: i32, %arg1: i32, %arg2: i32, %arg3: i32) -> (i32, i32, i32) {
    %c0_i32 = arith.constant 0 : i32
    %c0_i32_0 = arith.constant 0 : i32
    return %arg0, %arg1, %c0_i32 : i32, i32, i32
  }
  func.func @transform_1(%arg0: i32, %arg1: i32, %arg2: i32, %arg3: i32) -> (i32, i32, i32) {
    %c0_i32 = arith.constant 0 : i32
    %c0_i32_0 = arith.constant 0 : i32
    return %arg0, %arg2, %c0_i32 : i32, i32, i32
  }
  func.func @transform_2(%arg0: i32, %arg1: i32, %arg2: i32, %arg3: i32) -> (i32, i32) {
    %c0_i32 = arith.constant 0 : i32
    %c0_i32_0 = arith.constant 0 : i32
    return %c0_i32, %arg3 : i32, i32
  }
  func.func @transform_3(%arg0: i32, %arg1: i32, %arg2: i32, %arg3: i32) -> (i32, i32) {
    %c0_i32 = arith.constant 0 : i32
    %c0_i32_0 = arith.constant 0 : i32
    return %c0_i32, %arg3 : i32, i32
  }
  func.func @transform_4(%arg0: i32, %arg1: i32, %arg2: i32, %arg3: i32) -> (i32, i32, i32, i32) {
    %c0_i32 = arith.constant 0 : i32
    return %arg0, %arg1, %arg2, %arg3 : i32, i32, i32, i32
  }
}

</mosaic_0001>

<bundles_post_ra>
// kernel: tpu_custom_call.1
= control target key start
LH: loop header
LB: loop body
LE: loop exit
PB: predicated region body
PF: predicated region fallthrough
CT: control target
= control target key end

     0   :  { %s2686_s0 = inlined_call_operand.hbm [shape: f32[2,16,128], index: 0, kind: input, shape index: {}]   ;;  %s2687_s1 = inlined_call_operand.hbm [shape: f32[2,16,128], index: 1, kind: input, shape index: {}]   ;;  %s2688_s2 = inlined_call_operand.hbm [shape: bf16[128,256], index: 2, kind: input, shape index: {}]   ;;  %s2689_s3 = inlined_call_operand.vmem [shape: f32[1,256], index: 3, kind: input, shape index: {}]   ;;  %s2690_s4 = inlined_call_operand.hbm [shape: bf16[2,16,16,256], index: 4, kind: output, shape index: {}]  }
   0x1   :  { %2697 = sst [smem:[#allocation16_spill]] %s2688_s2 }
   0x2   :  { %9 = vsyncpa [#allocation4], 0 }
   0x3   :  { %11 = vsyncpa [#allocation4 + $0x1], 0 }
   0x4   :  { %12 = vsyncpa [#allocation7], 0 }
   0x5   :  { %14 = vsyncpa [#allocation7 + $0x1], 0 }
   0x6   :  { %15 = vsyncpa [#allocation5], 0 }
   0x7   :  { %17 = vsyncpa [#allocation5 + $0x1], 0  ;;  %s2270_s15 = smov 0   ;;  %s2272_s16 = smov 0  }
   0x8   :  { %s2274_s17 = smov 0   ;;  %s2276_s18 = smov 0  }
   0x9   :  { %s2278_s19 = smov 0   ;;  %s2280_s20 = smov 0  }
   0xa LB: > { %2698 = sst [smem:[#allocation14_spill]] %s2229_s19  ;;  %s2301_s21 = sadd.s32 4294967295, %s2233_s20   ;;  %s2233_s20 = sphi %s2280_s20, %s23_s20   ;;  %s2229_s19 = sphi %s2278_s19, %s2714_s19   ;;  %s2225_s18 = sphi %s2276_s18, %s2713_s18   ;;  %s2221_s17 = sphi %s2274_s17, %s2717_s17   ;;  %s2217_s16 = sphi %s2272_s16, %s2716_s16   ;;  %s2213_s15 = sphi %s2270_s15, %s2715_s15  }
   0xb   : > { %s1578_s22 = sadd.s32 4294967294, %s2233_s20   ;;  %p71_p0 = scmp.ne.s32.totalorder %s2217_s16, %s2213_s15 }
   0xc   : > { %p72_p1 = scmp.eq.s32.totalorder %s2301_s21, 0  ;;  %p187_p3 = scmp.eq.s32.totalorder %s1578_s22, 1 }
   0xd   : > { %p1579_p5 = scmp.ge.s32.totalorder %s2233_s20, 1  ;;  %p194_p7 = scmp.lt.s32.totalorder %s2233_s20, 3 }
   0xe   : > { %p2310_p4 = por %p72_p1, %p71_p0  ;;  %p2315_p6 = por %p187_p3, %p71_p0 }
   0xf   : > { %p2320_p8 = pnand %p1579_p5, %p194_p7  ;;  %s2235_s26 = smov [#allocation8]  }
  0x10   : > { %s2700_s24 = scalar_select %p2315_p6, 1, 0 }
  0x11   : > { %s209_s27 = sshll.u32 %s2235_s26, 4  ;;  %p1883_p9 = pneg %p2320_p8  ;;  %s210_s27 = int_to_ptr.vmem [resolvable:$true] %s209_s27 }
  0x12   : > { %s49_s29 = sadd.s32 1, %s2229_s19  ;;  %s2074_s30 = scalar_lea.vmem %s210_s27, 2048 }
  0x13   : > { %p2329_p11 = pnand %p1883_p9, %p72_p1  ;;  %p2075_p13 = scmp.ne.s32.totalorder %s210_s27, %s2074_s30 }
  0x14   : > { %p2082_p5 = scmp.lt.s32.totalorder %s210_s27, %s210_s27  ;;  %p2083_p7 = scmp.lt.s32.totalorder %s2074_s30, %s2074_s30 }
  0x15   : > { %p2065_p12 = pneg %p2329_p11 }
  0x16   : > { %p2084_p2 = por %p2083_p7, %p2082_p5 }
  0x17   : > { %p2077_p0 = pnand %p2075_p13, %p2065_p12 }
  0x19   : > { %p2078_p3 = pneg %p2077_p0 }
  0x1b   : > { %p2085_p6 = pnand %p2084_p2, %p2078_p3 }
  0x1d   : > { %2088 = shalt.err (!%p2085_p6)
}
  0x1e   : > { %s2691_s5 = smov 128   ;;  %s2693_s6 = smov 8  }
  0x1f   : > { %s2703_s2 = sld [smem:[#allocation16_spill]]  ;;  %p51_p2 = scmp.ge.s32.totalorder %s49_s29, 2 }
  0x20   : > { %s58_s9 = sadd.s32 1, %s2221_s17  ;;  %p65_p6 = scmp.ne.s32.totalorder %s2221_s17, %s2217_s16 }
  0x21   : > { %p66_p9 = scmp.eq.s32.totalorder %s2233_s20, 0  ;;  %s2719_s29 = smov (%p51_p2, %s49_s29), 0 }
  0x22   : > { %2704 = sst [smem:[#allocation15_spill]] %s2719_s29  ;;  %p2706_p13 = scmp.eq.s32.totalorder %s2301_s21, 1 }
  0x23   : > { %p2350_p12 = por %p66_p9, %p65_p6  ;;  %s53_s12 = ssub.s32 %s2229_s19, %s2719_s29 }
  0x24   : > { %p2356_p0 = por %p2706_p13, %p65_p6  ;;  %p1899_p3 = scmp.lt.s32.totalorder %s2233_s20, 2 }
  0x25   : > { %1886 = dma.hbm_to_vmem [thread:$0]  (!%p2329_p11), %s2703_s2, 2048, %s210_s27, [#allocation7], %s2691_s5, %s2691_s5, %s2693_s6  }
  0x26   : > { %p56_p11 = scmp.eq.s32.totalorder %s53_s12, 0  ;;  %s231_s13 = sand.u32 1, %s2221_s17  }
  0x27   : > { %s1583_s14 = sshll.u32 %s231_s13, 4  ;;  %s1695_s26 = sshll.u32 %s2229_s19, 8 }
  0x28   : > { %s2365_s22 = scalar_select %p56_p11, %s2221_s17, %s58_s9  }
  0x29   : > { %s243_s30 = scalar_lea.hbm %s2686_s0, %s1695_s26  ;;  %s235_s7 = scalar_lea.vmem [#allocation3], %s1583_s14 }
  0x2a   : > { %s244_s8 = sshll.u32 %s235_s7, 4  ;;  %p2373_p5 = pnand %p1899_p3, %p2350_p12  ;;  %s245_s8 = int_to_ptr.vmem [resolvable:$true] %s244_s8 }
  0x2b   : > { %s2380_s9 = scalar_lea.hbm %s2687_s1, %s1695_s26  ;;  %s258_s12 = scalar_lea.vmem [#allocation6], %s1583_s14 }
  0x2c   : > { %s267_s29 = sshll.u32 %s258_s12, 4  ;;  %s232_s19 = scalar_lea.sflag [#allocation4], %s231_s13  ;;  %s268_s29 = int_to_ptr.vmem [resolvable:$true] %s267_s29 }
  0x2d   : > { %p2091_p7 = pneg %p2373_p5  ;;  %s2102_s27 = scalar_lea.vmem %s245_s8, 256 }
  0x2e   : > { %p2103_p2 = scmp.ne.s32.totalorder %s245_s8, %s2102_s27  ;;  %s2238_s10 = smov [#allocation3]  }
  0x2f   : > { %s2107_s28 = sshll.u32 %s2238_s10, 4  ;;  %s2108_s28 = int_to_ptr.vmem [resolvable:$false] %s2107_s28 }
  0x30   : > { %p2105_p6 = pnand %p2103_p2, %p2091_p7  ;;  %s2109_s7 = scalar_lea.vmem %s2108_s28, 512 }
  0x31   : > { %p2110_p12 = scmp.lt.s32.totalorder %s245_s8, %s2108_s28  ;;  %p2111_p13 = scmp.lt.s32.totalorder %s2109_s7, %s2102_s27 }
  0x32   : > { %p2106_p9 = pneg %p2105_p6 }
  0x33   : > { %p2112_p3 = por %p2111_p13, %p2110_p12 }
  0x35   : > { %p2113_p11 = pnand %p2112_p3, %p2106_p9 }
  0x37   : > { %2116 = shalt.err (!%p2113_p11)
}
  0x38   : > { %s2709_s2 = smov 8   ;;  %s2710_s6 = smov 128  }
  0x39   : > { %1890 = dma.hbm_to_vmem [thread:$0]  (!%p2373_p5), %s243_s30, 256, %s245_s8, %s232_s19, %s2710_s6, %s2710_s6, %s2709_s2  }
  0x3a   : > { %s254_s13 = sand.u32 1, %s2233_s20   ;;  %s2130_s26 = scalar_lea.vmem %s268_s29, 256 }
  0x3b   : > { %s255_s14 = scalar_lea.sflag [#allocation7], %s254_s13  ;;  %p2131_p2 = scmp.ne.s32.totalorder %s268_s29, %s2130_s26 }
  0x3c   : > { %s2239_s12 = smov [#allocation6]  }
  0x3d   : > { %p2133_p6 = pnand %p2131_p2, %p2091_p7  ;;  %s2135_s27 = sshll.u32 %s2239_s12, 4  ;;  %s2136_s27 = int_to_ptr.vmem [resolvable:$false] %s2135_s27 }
  0x3e   : > { %s2137_s10 = scalar_lea.vmem %s2136_s27, 512  ;;  %p2138_p9 = scmp.lt.s32.totalorder %s268_s29, %s2136_s27 }
  0x3f   : > { %p2134_p10 = pneg %p2133_p6  ;;  %p2139_p12 = scmp.lt.s32.totalorder %s2137_s10, %s2130_s26 }
  0x41   : > { %p2140_p13 = por %p2139_p12, %p2138_p9 }
  0x43   : > { %p2141_p3 = pnand %p2140_p13, %p2134_p10 }
  0x45   : > { %2144 = shalt.err (!%p2141_p3)
}
  0x46   : > { %1893 = dma.hbm_to_vmem [thread:$0]  (!%p2373_p5), %s2380_s9, 256, %s268_s29, %s255_s14, %s2710_s6, %s2710_s6, %s2709_s2  }
  0x47   : > { %279 = sbr.rel (%p2320_p8) target bundleno = 397 (0x18d), region = 36  ;;  %s2405_s19 = sand.u32 (!%p2320_p8), 1, %s2217_s16  }
  0x48   : > { %s1590_s30 = sshll.u32 (!%p2320_p8), %s2405_s19, 4  ;;  %s282_s8 = scalar_lea.sflag (!%p2320_p8), [#allocation4], %s2405_s19 }
  0x49   : > { %s2409_s28 = scalar_lea.vmem (!%p2320_p8), [#allocation3], %s1590_s30 }
  0x4c   : > { %2196 = dma.done.wait (%p2310_p4), %s282_s8, 256  }
  0x4d   : > { %2198 = vsyncadd (%p2310_p4), %s282_s8, 4294967040  ;;  %s290_s29 = sand.u32 1, %s2301_s21   ;;  %s2416_s5 = scalar_lea.vmem [#allocation6], %s1590_s30 }
  0x4e   : > { %s291_s25 = scalar_lea.sflag [#allocation7], %s290_s29 }
  0x4f   : > { %2200 = dma.done.wait (%p2310_p4), %s291_s25, 256  }
  0x50   : > { %2202 = vsyncadd (%p2310_p4), %s291_s25, 4294967040 }
  0x51   : > { %2204 = dma.done.wait (%p72_p1), [#allocation7], 2048  }
  0x52   : > { %2206 = vsyncadd (%p72_p1), [#allocation7], 4294965248  ;;  %v2240_v0 = vmov 0   ;;  %v2241_v1 = vmov 1966171168   ;;  %v357_v3 = vlaneseq  ;;  %v348_v14 = vld [vmem:[%s2409_s28] sm:$0xff] }
  0x53   : > { %1024 = vmatprep.mubr.bf16.mxu0 %v2240_v0  ;;  %1104 = vmatprep.mubr.bf16.mxu1 %v2240_v0  ;;  %v355_v2 = vunpack.c.l.s4 %v2241_v1  ;;  %v1957_v4 = vld [vmem:[#allocation8 + $0x74] ss:$8 sps:$4 sm:$0xff]   ;;  %v1959_v5 = vld [vmem:[#allocation8 + $0x70] ss:$8 sps:$4 sm:$0xff]   ;;  %v1960_v6 = vld [vmem:[#allocation8 + $0x64] ss:$8 sps:$4 sm:$0xff]   ;;  %v353_v20 = vcombine.high %v348_v14, %v348_v14 }
  0x54   : > { %992 = vmatprep.subr.bf16.mxu0 %v1957_v4  ;;  %1857 = vmatprep.subr.bf16.mxu1 %v1957_v4  ;;  %v1962_v7 = vld [vmem:[#allocation8 + $0x60] ss:$8 sps:$4 sm:$0xff]   ;;  %v2428_v9 = vshrl.u32 %v357_v3, 7  ;;  %v1963_v10 = vld [vmem:[#allocation8 + $0x54] ss:$8 sps:$4 sm:$0xff]   ;;  %s1593_s9 = sshll.u32 %s2405_s19, 8 }
  0x55   : > { %993 = vmatpush1.bf16.msra.mxu0 %v1959_v5  ;;  %1865 = vmatpush1.bf16.msra.mxu1 %v1959_v5  ;;  %v356_v8 = vunpack.c.0.s8 %v355_v2  ;;  %v1965_v11 = vld [vmem:[#allocation8 + $0x50] ss:$8 sps:$4 sm:$0xff]   ;;  %v1966_v13 = vld [vmem:[#allocation8 + $0x44] ss:$8 sps:$4 sm:$0xff]   ;;  %v1968_v15 = vld [vmem:[#allocation8 + $0x40] ss:$8 sps:$4 sm:$0xff]  }
  0x56   : > { %994 = vmatprep.subr.bf16.mxu0 %v1960_v6  ;;  %1858 = vmatprep.subr.bf16.mxu1 %v1960_v6  ;;  %v2436_v17 = vsub.s32 0, %v2428_v9  ;;  %v1969_v18 = vld [vmem:[#allocation8 + $0x34] ss:$8 sps:$4 sm:$0xff]   ;;  %v1971_v26 = vld [vmem:[#allocation8 + $0x30] ss:$8 sps:$4 sm:$0xff]   ;;  %s2537_s7 = scalar_lea.vmem [#allocation9], %s1593_s9 }
  0x57   : > { %v2431_v12 = vsub.s32 %v356_v8, %v2428_v9  ;;  %v2439_v19 = vld [vmem:[%s2409_s28 + $0x8] sm:$0xff]  ;;  %v2445_v24 = vld [vmem:[%s2416_s5] sm:$0xff]  ;;  %s1761_s2 = sshll.u32 %s2225_s18, 12  ;;  %s1431_s6 = sshll.u32 %s2537_s7, 4  ;;  %s2636_s6 = int_to_ptr.vmem [resolvable:$true] %s1431_s6 }
  0x58   : > { %v2448_v25 = vld [vmem:[%s2416_s5 + $0x8] sm:$0xff]  ;;  %v555_v51 = vcombine.high %v2439_v19, %v2439_v19  ;;  %s2634_s26 = scalar_lea.hbm %s2690_s4, %s1761_s2  ;;  %s1410_s18 = scalar_lea.sflag [#allocation5], %s2405_s19 }
  0x59   : > { %995 = vmatpush1.bf16.msra.mxu0 %v1962_v7  ;;  %1866 = vmatpush1.bf16.msra.mxu1 %v1962_v7  ;;  %v360_v16 = vrot.slane %v348_v14, %v2431_v12  ;;  %v562_v22 = vrot.slane %v2439_v19, %v2431_v12  ;;  %v1972_v30 = vld [vmem:[#allocation8 + $0x24] ss:$8 sps:$4 sm:$0xff]   ;;  %v367_v33 = vrot.slane %v353_v20, %v2431_v12  ;;  %v1974_v42 = vld [vmem:[#allocation8 + $0x20] ss:$8 sps:$4 sm:$0xff]   ;;  %v1975_v46 = vld [vmem:[#allocation8 + $0x14] ss:$8 sps:$4 sm:$0xff]  }
  0x5a   : > { %996 = vmatprep.subr.bf16.mxu0 %v1963_v10  ;;  %1859 = vmatprep.subr.bf16.mxu1 %v1963_v10  ;;  %v1977_v55 = vld [vmem:[#allocation8 + $0x10] ss:$8 sps:$4 sm:$0xff]   ;;  %v1978_v58 = vld [vmem:[#allocation8 + $0x4] ss:$8 sps:$4 sm:$0xff]   ;;  %v569_v62 = vrot.slane %v555_v51, %v2431_v12  ;;  %v1980_v3 = vld [vmem:[#allocation8] ss:$8 sps:$4 sm:$0xff]  }
  0x5b   : > { %v376_v21 = vrot.slane %v360_v16, %v2431_v12  ;;  %v368_v23 = vcombine.high %v360_v16, %v360_v16  ;;  %v578_v28 = vrot.slane %v562_v22, %v2431_v12  ;;  %v570_v31 = vcombine.high %v562_v22, %v562_v22  ;;  %s2145_s12 = scalar_lea.vmem %s2636_s6, 4096  ;;  %s2242_s27 = smov [#allocation9]  }
  0x5c   : > { %v383_v57 = vrot.slane %v367_v33, %v2431_v12  ;;  %v369_v63 = vcombine.high %v367_v33, %v367_v33  ;;  %v585_v5 = vrot.slane %v569_v62, %v2431_v12  ;;  %v571_v8 = vcombine.high %v569_v62, %v569_v62  ;;  %p2146_p1 = scmp.ne.s32.totalorder %s2636_s6, %s2145_s12  ;;  %s2149_s10 = sshll.u32 %s2242_s27, 4  ;;  %s2150_s10 = int_to_ptr.vmem [resolvable:$false] %s2149_s10 }
  0x5d   : > { %997 = vmatpush1.bf16.msra.mxu0 %v1965_v11  ;;  %1867 = vmatpush1.bf16.msra.mxu1 %v1965_v11  ;;  %v405_v27 = vrot.slane %v376_v21, %v2436_v17  ;;  %v390_v29 = vrot.slane %v368_v23, %v2431_v12  ;;  %v398_v32 = vcombine.high %v376_v21, %v376_v21  ;;  %s2151_s30 = scalar_lea.vmem %s2150_s10, 8192  ;;  %p2152_p10 = scmp.lt.s32.totalorder %s2636_s6, %s2150_s10 }
  0x5e   : > { %998 = vmatprep.subr.bf16.mxu0 %v1966_v13  ;;  %1860 = vmatprep.subr.bf16.mxu1 %v1966_v13  ;;  %v607_v36 = vrot.slane %v578_v28, %v2436_v17  ;;  %v592_v38 = vrot.slane %v570_v31, %v2431_v12  ;;  %v600_v40 = vcombine.high %v578_v28, %v578_v28  ;;  %p2147_p4 = pnand %p2146_p1, %p2356_p0  ;;  %p2153_p5 = scmp.lt.s32.totalorder %s2151_s30, %s2145_s12 }
  0x5f   : > { %v442_v34 = vadd.f32 %v405_v27, %v2445_v24  ;;  %v443_v35 = vadd.f32 %v405_v27, %v2448_v25  ;;  %v409_v37 = vrot.slane %v390_v29, %v2436_v17  ;;  %v413_v39 = vrot.slane %v398_v32, %v2436_v17 }
  0x60   : > { %v400_v41 = vcombine.high %v390_v29, %v390_v29  ;;  %v644_v43 = vadd.f32 %v607_v36, %v2445_v24  ;;  %v645_v44 = vadd.f32 %v607_v36, %v2448_v25  ;;  %v611_v48 = vrot.slane %v592_v38, %v2436_v17  ;;  %p2148_p8 = pneg %p2147_p4  ;;  %p2154_p7 = por %p2153_p5, %p2152_p10 }
  0x61   : > { %999 = vmatpush1.bf16.msra.mxu0 %v1968_v15  ;;  %1868 = vmatpush1.bf16.msra.mxu1 %v1968_v15  ;;  %1999 = vtanh.f32 %v442_v34  ;;  %v444_v45 = vadd.f32 %v409_v37, %v2445_v24  ;;  %v445_v47 = vadd.f32 %v409_v37, %v2448_v25  ;;  %v615_v49 = vrot.slane %v600_v40, %v2436_v17 }
  0x62   : > { %1000 = vmatprep.subr.bf16.mxu0 %v1969_v18  ;;  %1861 = vmatprep.subr.bf16.mxu1 %v1969_v18  ;;  %2001 = vtanh.f32 %v443_v35  ;;  %v417_v50 = vrot.slane %v400_v41, %v2436_v17  ;;  %v646_v52 = vadd.f32 %v611_v48, %v2445_v24  ;;  %v647_v53 = vadd.f32 %v611_v48, %v2448_v25  ;;  %p2155_p11 = pnand %p2154_p7, %p2148_p8 }
  0x63   : > { %2003 = vtanh.f32 %v644_v43  ;;  %v602_v54 = vcombine.high %v592_v38, %v592_v38  ;;  %v446_v56 = vadd.f32 %v413_v39, %v2445_v24  ;;  %v447_v59 = vadd.f32 %v413_v39, %v2448_v25 }
  0x64   : > { %2005 = vtanh.f32 %v645_v44  ;;  %v648_v60 = vadd.f32 %v615_v49, %v2445_v24  ;;  %v649_v1 = vadd.f32 %v615_v49, %v2448_v25  ;;  %v448_v2 = vadd.f32 %v417_v50, %v2445_v24 }
  0x65   : > { %1001 = vmatpush1.bf16.msra.mxu0 %v1971_v26  ;;  %1869 = vmatpush1.bf16.msra.mxu1 %v1971_v26  ;;  %2007 = vtanh.f32 %v444_v45  ;;  %v619_v61 = vrot.slane %v602_v54, %v2436_v17  ;;  %v421_v4 = vrot.slane %v383_v57, %v2436_v17  ;;  %v397_v6 = vrot.slane %v369_v63, %v2431_v12 }
  0x66   : > { %1002 = vmatprep.subr.bf16.mxu0 %v1972_v30  ;;  %1862 = vmatprep.subr.bf16.mxu1 %v1972_v30  ;;  %2009 = vtanh.f32 %v445_v47  ;;  %v449_v7 = vadd.f32 %v417_v50, %v2448_v25  ;;  %v623_v11 = vrot.slane %v585_v5, %v2436_v17  ;;  %v599_v14 = vrot.slane %v571_v8, %v2431_v12 }
  0x67   : > { %2011 = vtanh.f32 %v646_v52  ;;  %v650_v10 = vadd.f32 %v619_v61, %v2445_v24  ;;  %v651_v13 = vadd.f32 %v619_v61, %v2448_v25  ;;  %v450_v15 = vadd.f32 %v421_v4, %v2445_v24 }
  0x68   : > { %2013 = vtanh.f32 %v647_v53  ;;  %v425_v16 = vrot.slane %v397_v6, %v2436_v17  ;;  %v399_v18 = vcombine.high %v383_v57, %v383_v57  ;;  %v451_v20 = vadd.f32 %v421_v4, %v2448_v25 }
  0x69   : > { %1003 = vmatpush1.bf16.msra.mxu0 %v1974_v42  ;;  %1870 = vmatpush1.bf16.msra.mxu1 %v1974_v42  ;;  %2015 = vtanh.f32 %v446_v56  ;;  %v652_v22 = vadd.f32 %v623_v11, %v2445_v24  ;;  %v627_v23 = vrot.slane %v599_v14, %v2436_v17  ;;  %v601_v26 = vcombine.high %v585_v5, %v585_v5 }
  0x6a   : > { %1004 = vmatprep.subr.bf16.mxu0 %v1975_v46  ;;  %1863 = vmatprep.subr.bf16.mxu1 %v1975_v46  ;;  %2017 = vtanh.f32 %v447_v59  ;;  %v653_v28 = vadd.f32 %v623_v11, %v2448_v25  ;;  %v452_v30 = vadd.f32 %v425_v16, %v2445_v24  ;;  %v429_v31 = vrot.slane %v399_v18, %v2436_v17 }
  0x6b   : > { %2019 = vtanh.f32 %v648_v60  ;;  %v401_v32 = vcombine.high %v397_v6, %v397_v6  ;;  %v453_v35 = vadd.f32 %v425_v16, %v2448_v25  ;;  %v654_v37 = vadd.f32 %v627_v23, %v2445_v24 }
  0x6c   : > { %2021 = vtanh.f32 %v649_v1  ;;  %v631_v38 = vrot.slane %v601_v26, %v2436_v17  ;;  %v603_v39 = vcombine.high %v599_v14, %v599_v14  ;;  %v655_v42 = vadd.f32 %v627_v23, %v2448_v25 }
  0x6d   : > { %1005 = vmatpush1.bf16.msra.mxu0 %v1977_v55  ;;  %1871 = vmatpush1.bf16.msra.mxu1 %v1977_v55  ;;  %2023 = vtanh.f32 %v448_v2  ;;  %v454_v44 = vadd.f32 %v429_v31, %v2445_v24  ;;  %v433_v45 = vrot.slane %v401_v32, %v2436_v17  ;;  %v455_v48 = vadd.f32 %v429_v31, %v2448_v25 }
  0x6e   : > { %1006 = vmatprep.subr.bf16.mxu0 %v1978_v58  ;;  %1864 = vmatprep.subr.bf16.mxu1 %v1978_v58  ;;  %v2000_v19 = vpop.eup %1999  ;;  %2025 = vtanh.f32 %v449_v7  ;;  %v656_v50 = vadd.f32 %v631_v38, %v2445_v24  ;;  %v635_v51 = vrot.slane %v603_v39, %v2436_v17  ;;  %v657_v54 = vadd.f32 %v631_v38, %v2448_v25 }
  0x6f   : > { %v2002_v21 = vpop.eup %2001  ;;  %2027 = vtanh.f32 %v650_v10  ;;  %v456_v57 = vadd.f32 %v433_v45, %v2445_v24  ;;  %v457_v60 = vadd.f32 %v433_v45, %v2448_v25 }
  0x70   : > { %v2004_v12 = vpop.eup %2003  ;;  %v1765_v27 = vpack.c.bf16 %v2002_v21, %v2000_v19  ;;  %2029 = vtanh.f32 %v651_v13  ;;  %v658_v63 = vadd.f32 %v635_v51, %v2445_v24 }
  0x71   : > { %1007 = vmatpush1.bf16.msra.mxu0 %v1980_v3  ;;  %1872 = vmatpush1.bf16.msra.mxu1 %v1980_v3  ;;  %v2006_v29 = vpop.eup %2005  ;;  %2031 = vtanh.f32 %v450_v15  ;;  %v659_v3 = vadd.f32 %v635_v51, %v2448_v25 }
  0x72   : > { %v2008_v33 = vpop.eup %2007  ;;  %1766 = vst [vmem:[#allocation2] sm:$0xff] %v1765_v27   ;;  %v1805_v34 = vpack.c.bf16 %v2006_v29, %v2004_v12  ;;  %2033 = vtanh.f32 %v451_v20 }
  0x73   : > { %v2010_v36 = vpop.eup %2009  ;;  %2035 = vtanh.f32 %v652_v22 }
  0x74   : > { %v2012_v40 = vpop.eup %2011  ;;  %1849 = vst [vmem:[#allocation2 + $0x40] sm:$0xff] %v1805_v34   ;;  %v1770_v41 = vpack.c.bf16 %v2010_v36, %v2008_v33  ;;  %2037 = vtanh.f32 %v653_v28 }
  0x75   : > { %v2014_v43 = vpop.eup %2013  ;;  %2039 = vtanh.f32 %v452_v30 }
  0x76   : > { %v2016_v46 = vpop.eup %2015  ;;  %1842 = vst [vmem:[#allocation2 + $0x8] sm:$0xff] %v1770_v41   ;;  %v1810_v47 = vpack.c.bf16 %v2014_v43, %v2012_v40  ;;  %2041 = vtanh.f32 %v453_v35 }
  0x77   : > { %v2018_v49 = vpop.eup %2017  ;;  %2043 = vtanh.f32 %v654_v37 }
  0x78   : > { %v2020_v52 = vpop.eup %2019  ;;  %1850 = vst [vmem:[#allocation2 + $0x48] sm:$0xff] %v1810_v47   ;;  %v1775_v53 = vpack.c.bf16 %v2018_v49, %v2016_v46  ;;  %2045 = vtanh.f32 %v655_v42  ;;  %v812_v46 = vsub.s32 1, %v2428_v9  ;;  %v804_v47 = vld [vmem:[%s2689_s3] sm:$0x3] }
  0x79   : > { %v2022_v55 = vpop.eup %2021  ;;  %v1981_v56 = vld [vmem:[#allocation2] sm:$0xff]   ;;  %2047 = vtanh.f32 %v454_v44 }
  0x7a   : > { %v2024_v58 = vpop.eup %2023  ;;  %1843 = vst [vmem:[#allocation2 + $0x10] sm:$0xff] %v1775_v53   ;;  %v1815_v59 = vpack.c.bf16 %v2022_v55, %v2020_v52  ;;  %2049 = vtanh.f32 %v455_v48  ;;  %1025 = vmatmul.mubr.bf16.vlgmr.msra.gmra.mxu0 %v1981_v56  ;;  %v2528_v48 = vrot.slane %v804_v47, %v2436_v17  ;;  %v2530_v49 = vrot.slane %v804_v47, %v812_v46 }
  0x7b   : > { %v2026_v61 = vpop.eup %2025  ;;  %v1982_v62 = vld [vmem:[#allocation2 + $0x40] sm:$0xff]   ;;  %2051 = vtanh.f32 %v656_v50  ;;  %1034 = vmatprep.mubr.bf16.mxu0 %v2240_v0 }
  0x7c   : > { %v2028_v1 = vpop.eup %2027  ;;  %1851 = vst [vmem:[#allocation2 + $0x50] sm:$0xff] %v1815_v59   ;;  %v1780_v2 = vpack.c.bf16 %v2026_v61, %v2024_v58  ;;  %2053 = vtanh.f32 %v657_v54  ;;  %1105 = vmatmul.mubr.bf16.vlgmr.msra.gmra.mxu1 %v1982_v62 }
  0x7d   : > { %v2030_v4 = vpop.eup %2029  ;;  %2055 = vtanh.f32 %v456_v57  ;;  %1114 = vmatprep.mubr.bf16.mxu1 %v2240_v0  ;;  %v1983_v8 = vld [vmem:[#allocation2 + $0x8] sm:$0xff]  }
  0x7e   : > { %v2032_v5 = vpop.eup %2031  ;;  %1844 = vst [vmem:[#allocation2 + $0x18] sm:$0xff] %v1780_v2   ;;  %v1820_v6 = vpack.c.bf16 %v2030_v4, %v2028_v1  ;;  %2057 = vtanh.f32 %v457_v60 }
  0x7f   : > { %v2034_v7 = vpop.eup %2033  ;;  %2059 = vtanh.f32 %v658_v63  ;;  %v1984_v13 = vld [vmem:[#allocation2 + $0x48] sm:$0xff]  }
  0x80   : > { %v2036_v24 = vpop.eup %2035  ;;  %1852 = vst [vmem:[#allocation2 + $0x58] sm:$0xff] %v1820_v6   ;;  %v1785_v10 = vpack.c.bf16 %v2034_v7, %v2032_v5  ;;  %2061 = vtanh.f32 %v659_v3 }
  0x81   : > { %v2038_v11 = vpop.eup %2037  ;;  %v1985_v23 = vld [vmem:[#allocation2 + $0x10] sm:$0xff]  }
  0x82   : > { %v2040_v14 = vpop.eup %2039  ;;  %1845 = vst [vmem:[#allocation2 + $0x20] sm:$0xff] %v1785_v10   ;;  %v1825_v25 = vpack.c.bf16 %v2038_v11, %v2036_v24  ;;  %1035 = vmatmul.mubr.bf16.gmra.mxu0 %v1983_v8 }
  0x83   : > { %v2042_v15 = vpop.eup %2041  ;;  %1044 = vmatprep.mubr.bf16.mxu0 %v2240_v0  ;;  %v1986_v28 = vld [vmem:[#allocation2 + $0x50] sm:$0xff]  }
  0x84   : > { %v2044_v16 = vpop.eup %2043  ;;  %1853 = vst [vmem:[#allocation2 + $0x60] sm:$0xff] %v1825_v25   ;;  %v1790_v18 = vpack.c.bf16 %v2042_v15, %v2040_v14  ;;  %1115 = vmatmul.mubr.bf16.gmra.mxu1 %v1984_v13 }
  0x85   : > { %v2046_v19 = vpop.eup %2045  ;;  %1124 = vmatprep.mubr.bf16.mxu1 %v2240_v0  ;;  %v1987_v36 = vld [vmem:[#allocation2 + $0x18] sm:$0xff]  }
  0x86   : > { %v2048_v20 = vpop.eup %2047  ;;  %1846 = vst [vmem:[#allocation2 + $0x28] sm:$0xff] %v1790_v18   ;;  %v1830_v21 = vpack.c.bf16 %v2046_v19, %v2044_v16 }
  0x87   : > { %v2050_v22 = vpop.eup %2049  ;;  %v1988_v37 = vld [vmem:[#allocation2 + $0x58] sm:$0xff]  }
  0x88   : > { %v2052_v26 = vpop.eup %2051  ;;  %1854 = vst [vmem:[#allocation2 + $0x68] sm:$0xff] %v1830_v21   ;;  %v1795_v12 = vpack.c.bf16 %v2050_v22, %v2048_v20 }
  0x89   : > { %v2054_v27 = vpop.eup %2053  ;;  %v1990_v38 = vld [vmem:[#allocation2 + $0x20] sm:$0xff]  }
  0x8a   : > { %v2056_v29 = vpop.eup %2055  ;;  %1847 = vst [vmem:[#allocation2 + $0x30] sm:$0xff] %v1795_v12   ;;  %v1835_v30 = vpack.c.bf16 %v2054_v27, %v2052_v26  ;;  %1045 = vmatmul.mubr.bf16.gmra.mxu0 %v1985_v23 }
  0x8b   : > { %v2058_v31 = vpop.eup %2057  ;;  %1054 = vmatprep.mubr.bf16.mxu0 %v2240_v0  ;;  %v1992_v39 = vld [vmem:[#allocation2 + $0x60] sm:$0xff]  }
  0x8c   : > { %v2060_v32 = vpop.eup %2059  ;;  %1855 = vst [vmem:[#allocation2 + $0x70] sm:$0xff] %v1835_v30   ;;  %v1800_v33 = vpack.c.bf16 %v2058_v31, %v2056_v29  ;;  %1125 = vmatmul.mubr.bf16.gmra.mxu1 %v1986_v28 }
  0x8d   : > { %v2062_v34 = vpop.eup %2061  ;;  %1134 = vmatprep.mubr.bf16.mxu1 %v2240_v0  ;;  %v1993_v40 = vld [vmem:[#allocation2 + $0x28] sm:$0xff]  }
  0x8e   : > { %1848 = vst [vmem:[#allocation2 + $0x38] sm:$0xff] %v1800_v33   ;;  %v1840_v35 = vpack.c.bf16 %v2062_v34, %v2060_v32 }
  0x8f   : > { %v1994_v41 = vld [vmem:[#allocation2 + $0x68] sm:$0xff]  }
  0x90   : > { %1856 = vst [vmem:[#allocation2 + $0x78] sm:$0xff] %v1840_v35  }
  0x91   : > { %v1995_v42 = vld [vmem:[#allocation2 + $0x30] sm:$0xff]  }
  0x92   : > { %1055 = vmatmul.mubr.bf16.gmra.mxu0 %v1987_v36 }
  0x93   : > { %1064 = vmatprep.mubr.bf16.mxu0 %v2240_v0  ;;  %v1996_v43 = vld [vmem:[#allocation2 + $0x70] sm:$0xff]  }
  0x94   : > { %1135 = vmatmul.mubr.bf16.gmra.mxu1 %v1988_v37 }
  0x95   : > { %1144 = vmatprep.mubr.bf16.mxu1 %v2240_v0  ;;  %v1997_v44 = vld [vmem:[#allocation2 + $0x38] sm:$0xff]  }
  0x97   : > { %v1998_v45 = vld [vmem:[#allocation2 + $0x78] sm:$0xff]  }
  0x9a   : > { %1065 = vmatmul.mubr.bf16.gmra.mxu0 %v1990_v38 }
  0x9b   : > { %1074 = vmatprep.mubr.bf16.mxu0 %v2240_v0 }
  0x9c   : > { %1145 = vmatmul.mubr.bf16.gmra.mxu1 %v1992_v39 }
  0x9d   : > { %1154 = vmatprep.mubr.bf16.mxu1 %v2240_v0 }
  0xa2   : > { %1075 = vmatmul.mubr.bf16.gmra.mxu0 %v1993_v40 }
  0xa3   : > { %1084 = vmatprep.mubr.bf16.mxu0 %v2240_v0 }
  0xa4   : > { %1155 = vmatmul.mubr.bf16.gmra.mxu1 %v1994_v41 }
  0xa5   : > { %1164 = vmatprep.mubr.bf16.mxu1 %v2240_v0 }
  0xaa   : > { %1085 = vmatmul.mubr.bf16.gmra.mxu0 %v1995_v42 }
  0xab   : > { %1094 = vmatprep.mubr.bf16.mxu0 %v2240_v0 }
  0xac   : > { %1165 = vmatmul.mubr.bf16.gmra.mxu1 %v1996_v43 }
  0xad   : > { %1174 = vmatprep.mubr.bf16.mxu1 %v2240_v0 }
  0xb2   : > { %1095 = vmatmul.mubr.bf16.gmra.mxu0 %v1997_v44 }
  0xb4   : > { %1175 = vmatmul.mubr.bf16.gmra.mxu1 %v1998_v45 }
 0x13a   : > { %v1026_v50 = vpop.f32.mrf.mxu0 }
 0x13b   : > { %v1027_v0 = vadd.f32 %v1026_v50, %v2528_v48 }
 0x13c   : > { %v1106_v51 = vpop.f32.mrf.mxu1  ;;  %v1028_v52 = vpop.f32.mrf.mxu0 }
 0x13d   : > { %v1029_v53 = vadd.f32 %v1028_v52, %v2530_v49  ;;  %v1107_v9 = vadd.f32 %v1106_v51, %v2528_v48 }
 0x13e   : > { %v1108_v54 = vpop.f32.mrf.mxu1  ;;  %v1030_v55 = vpop.f32.mrf.mxu0 }
 0x13f   : > { %v1729_v56 = vpack.c.bf16 %v1029_v53, %v1027_v0  ;;  %v1109_v57 = vadd.f32 %v1108_v54, %v2530_v49  ;;  %v1031_v60 = vadd.f32 %v1030_v55, %v2528_v48 }
 0x140   : > { %v1110_v58 = vpop.f32.mrf.mxu1  ;;  %v1032_v17 = vpop.f32.mrf.mxu0 }
 0x141   : > { %1377 = vst [vmem:[%s2537_s7] sm:$0xff] %v1729_v56  ;;  %v1745_v59 = vpack.c.bf16 %v1109_v57, %v1107_v9  ;;  %v1033_v61 = vadd.f32 %v1032_v17, %v2530_v49  ;;  %v1111_v1 = vadd.f32 %v1110_v58, %v2528_v48 }
 0x142   : > { %v1112_v62 = vpop.f32.mrf.mxu1  ;;  %v1036_v63 = vpop.f32.mrf.mxu0 }
 0x143   : > { %1393 = vst [vmem:[%s2537_s7 + $0x80] sm:$0xff] %v1745_v59  ;;  %v1730_v2 = vpack.c.bf16 %v1033_v61, %v1031_v60  ;;  %v1113_v3 = vadd.f32 %v1112_v62, %v2530_v49  ;;  %v1037_v7 = vadd.f32 %v1036_v63, %v2528_v48 }
 0x144   : > { %v1116_v4 = vpop.f32.mrf.mxu1  ;;  %v1038_v5 = vpop.f32.mrf.mxu0 }
 0x145   : > { %1378 = vst [vmem:[%s2537_s7 + $0x8] sm:$0xff] %v1730_v2  ;;  %v1746_v6 = vpack.c.bf16 %v1113_v3, %v1111_v1  ;;  %v1039_v8 = vadd.f32 %v1038_v5, %v2530_v49  ;;  %v1117_v11 = vadd.f32 %v1116_v4, %v2528_v48 }
 0x146   : > { %v1118_v24 = vpop.f32.mrf.mxu1  ;;  %v1040_v10 = vpop.f32.mrf.mxu0 }
 0x147   : > { %1394 = vst [vmem:[%s2537_s7 + $0x88] sm:$0xff] %v1746_v6  ;;  %v1731_v13 = vpack.c.bf16 %v1039_v8, %v1037_v7  ;;  %v1119_v14 = vadd.f32 %v1118_v24, %v2530_v49  ;;  %v1041_v18 = vadd.f32 %v1040_v10, %v2528_v48 }
 0x148   : > { %v1120_v25 = vpop.f32.mrf.mxu1  ;;  %v1042_v15 = vpop.f32.mrf.mxu0 }
 0x149   : > { %1379 = vst [vmem:[%s2537_s7 + $0x10] sm:$0xff] %v1731_v13  ;;  %v1747_v16 = vpack.c.bf16 %v1119_v14, %v1117_v11  ;;  %v1043_v19 = vadd.f32 %v1042_v15, %v2530_v49  ;;  %v1121_v22 = vadd.f32 %v1120_v25, %v2528_v48 }
 0x14a   : > { %v1122_v20 = vpop.f32.mrf.mxu1  ;;  %v1046_v21 = vpop.f32.mrf.mxu0 }
 0x14b   : > { %1395 = vst [vmem:[%s2537_s7 + $0x90] sm:$0xff] %v1747_v16  ;;  %v1732_v23 = vpack.c.bf16 %v1043_v19, %v1041_v18  ;;  %v1123_v26 = vadd.f32 %v1122_v20, %v2530_v49  ;;  %v1047_v29 = vadd.f32 %v1046_v21, %v2528_v48 }
 0x14c   : > { %v1126_v12 = vpop.f32.mrf.mxu1  ;;  %v1048_v27 = vpop.f32.mrf.mxu0 }
 0x14d   : > { %1380 = vst [vmem:[%s2537_s7 + $0x18] sm:$0xff] %v1732_v23  ;;  %v1748_v28 = vpack.c.bf16 %v1123_v26, %v1121_v22  ;;  %v1049_v30 = vadd.f32 %v1048_v27, %v2530_v49  ;;  %v1127_v33 = vadd.f32 %v1126_v12, %v2528_v48 }
 0x14e   : > { %v1128_v31 = vpop.f32.mrf.mxu1  ;;  %v1050_v32 = vpop.f32.mrf.mxu0 }
 0x14f   : > { %1396 = vst [vmem:[%s2537_s7 + $0x98] sm:$0xff] %v1748_v28  ;;  %v1733_v34 = vpack.c.bf16 %v1049_v30, %v1047_v29  ;;  %v1129_v35 = vadd.f32 %v1128_v31, %v2530_v49  ;;  %v1051_v39 = vadd.f32 %v1050_v32, %v2528_v48 }
 0x150   : > { %v1130_v36 = vpop.f32.mrf.mxu1  ;;  %v1052_v37 = vpop.f32.mrf.mxu0 }
 0x151   : > { %1381 = vst [vmem:[%s2537_s7 + $0x20] sm:$0xff] %v1733_v34  ;;  %v1749_v38 = vpack.c.bf16 %v1129_v35, %v1127_v33  ;;  %v1053_v40 = vadd.f32 %v1052_v37, %v2530_v49  ;;  %v1131_v43 = vadd.f32 %v1130_v36, %v2528_v48 }
 0x152   : > { %v1132_v41 = vpop.f32.mrf.mxu1  ;;  %v1056_v42 = vpop.f32.mrf.mxu0 }
 0x153   : > { %1397 = vst [vmem:[%s2537_s7 + $0xa0] sm:$0xff] %v1749_v38  ;;  %v1734_v44 = vpack.c.bf16 %v1053_v40, %v1051_v39  ;;  %v1133_v45 = vadd.f32 %v1132_v41, %v2530_v49  ;;  %v1057_v51 = vadd.f32 %v1056_v42, %v2528_v48 }
 0x154   : > { %v1136_v46 = vpop.f32.mrf.mxu1  ;;  %v1058_v47 = vpop.f32.mrf.mxu0 }
 0x155   : > { %1382 = vst [vmem:[%s2537_s7 + $0x28] sm:$0xff] %v1734_v44  ;;  %v1750_v50 = vpack.c.bf16 %v1133_v45, %v1131_v43  ;;  %v1059_v52 = vadd.f32 %v1058_v47, %v2530_v49  ;;  %v1137_v54 = vadd.f32 %v1136_v46, %v2528_v48 }
 0x156   : > { %v1138_v0 = vpop.f32.mrf.mxu1  ;;  %v1060_v53 = vpop.f32.mrf.mxu0 }
 0x157   : > { %1398 = vst [vmem:[%s2537_s7 + $0xa8] sm:$0xff] %v1750_v50  ;;  %v1735_v55 = vpack.c.bf16 %v1059_v52, %v1057_v51  ;;  %v1139_v9 = vadd.f32 %v1138_v0, %v2530_v49  ;;  %v1061_v17 = vadd.f32 %v1060_v53, %v2528_v48 }
 0x158   : > { %v1140_v56 = vpop.f32.mrf.mxu1  ;;  %v1062_v57 = vpop.f32.mrf.mxu0 }
 0x159   : > { %1383 = vst [vmem:[%s2537_s7 + $0x30] sm:$0xff] %v1735_v55  ;;  %v1751_v58 = vpack.c.bf16 %v1139_v9, %v1137_v54  ;;  %v1063_v59 = vadd.f32 %v1062_v57, %v2530_v49  ;;  %v1141_v62 = vadd.f32 %v1140_v56, %v2528_v48 }
 0x15a   : > { %v1142_v60 = vpop.f32.mrf.mxu1  ;;  %v1066_v61 = vpop.f32.mrf.mxu0 }
 0x15b   : > { %1399 = vst [vmem:[%s2537_s7 + $0xb0] sm:$0xff] %v1751_v58  ;;  %v1736_v63 = vpack.c.bf16 %v1063_v59, %v1061_v17  ;;  %v1143_v1 = vadd.f32 %v1142_v60, %v2530_v49  ;;  %v1067_v5 = vadd.f32 %v1066_v61, %v2528_v48 }
 0x15c   : > { %v1146_v2 = vpop.f32.mrf.mxu1  ;;  %v1068_v3 = vpop.f32.mrf.mxu0 }
 0x15d   : > { %1384 = vst [vmem:[%s2537_s7 + $0x38] sm:$0xff] %v1736_v63  ;;  %v1752_v4 = vpack.c.bf16 %v1143_v1, %v1141_v62  ;;  %v1069_v6 = vadd.f32 %v1068_v3, %v2530_v49  ;;  %v1147_v24 = vadd.f32 %v1146_v2, %v2528_v48 }
 0x15e   : > { %v1148_v7 = vpop.f32.mrf.mxu1  ;;  %v1070_v8 = vpop.f32.mrf.mxu0 }
 0x15f   : > { %1400 = vst [vmem:[%s2537_s7 + $0xb8] sm:$0xff] %v1752_v4  ;;  %v1737_v10 = vpack.c.bf16 %v1069_v6, %v1067_v5  ;;  %v1149_v11 = vadd.f32 %v1148_v7, %v2530_v49  ;;  %v1071_v15 = vadd.f32 %v1070_v8, %v2528_v48 }
 0x160   : > { %v1150_v13 = vpop.f32.mrf.mxu1  ;;  %v1072_v14 = vpop.f32.mrf.mxu0 }
 0x161   : > { %1385 = vst [vmem:[%s2537_s7 + $0x40] sm:$0xff] %v1737_v10  ;;  %v1753_v25 = vpack.c.bf16 %v1149_v11, %v1147_v24  ;;  %v1073_v16 = vadd.f32 %v1072_v14, %v2530_v49  ;;  %v1151_v20 = vadd.f32 %v1150_v13, %v2528_v48 }
 0x162   : > { %v1152_v18 = vpop.f32.mrf.mxu1  ;;  %v1076_v19 = vpop.f32.mrf.mxu0 }
 0x163   : > { %1401 = vst [vmem:[%s2537_s7 + $0xc0] sm:$0xff] %v1753_v25  ;;  %v1738_v21 = vpack.c.bf16 %v1073_v16, %v1071_v15  ;;  %v1153_v22 = vadd.f32 %v1152_v18, %v2530_v49  ;;  %v1077_v27 = vadd.f32 %v1076_v19, %v2528_v48 }
 0x164   : > { %v1156_v23 = vpop.f32.mrf.mxu1  ;;  %v1078_v26 = vpop.f32.mrf.mxu0 }
 0x165   : > { %1386 = vst [vmem:[%s2537_s7 + $0x48] sm:$0xff] %v1738_v21  ;;  %v1754_v12 = vpack.c.bf16 %v1153_v22, %v1151_v20  ;;  %v1079_v28 = vadd.f32 %v1078_v26, %v2530_v49  ;;  %v1157_v31 = vadd.f32 %v1156_v23, %v2528_v48 }
 0x166   : > { %v1158_v29 = vpop.f32.mrf.mxu1  ;;  %v1080_v30 = vpop.f32.mrf.mxu0 }
 0x167   : > { %1402 = vst [vmem:[%s2537_s7 + $0xc8] sm:$0xff] %v1754_v12  ;;  %v1739_v32 = vpack.c.bf16 %v1079_v28, %v1077_v27  ;;  %v1159_v33 = vadd.f32 %v1158_v29, %v2530_v49  ;;  %v1081_v37 = vadd.f32 %v1080_v30, %v2528_v48 }
 0x168   : > { %v1160_v34 = vpop.f32.mrf.mxu1  ;;  %v1082_v35 = vpop.f32.mrf.mxu0 }
 0x169   : > { %1387 = vst [vmem:[%s2537_s7 + $0x50] sm:$0xff] %v1739_v32  ;;  %v1755_v36 = vpack.c.bf16 %v1159_v33, %v1157_v31  ;;  %v1083_v38 = vadd.f32 %v1082_v35, %v2530_v49  ;;  %v1161_v41 = vadd.f32 %v1160_v34, %v2528_v48 }
 0x16a   : > { %v1162_v39 = vpop.f32.mrf.mxu1  ;;  %v1086_v40 = vpop.f32.mrf.mxu0 }
 0x16b   : > { %1403 = vst [vmem:[%s2537_s7 + $0xd0] sm:$0xff] %v1755_v36  ;;  %v1740_v42 = vpack.c.bf16 %v1083_v38, %v1081_v37  ;;  %v1163_v43 = vadd.f32 %v1162_v39, %v2530_v49  ;;  %v1087_v47 = vadd.f32 %v1086_v40, %v2528_v48 }
 0x16c   : > { %v1166_v44 = vpop.f32.mrf.mxu1  ;;  %v1088_v45 = vpop.f32.mrf.mxu0 }
 0x16d   : > { %1388 = vst [vmem:[%s2537_s7 + $0x58] sm:$0xff] %v1740_v42  ;;  %v1756_v46 = vpack.c.bf16 %v1163_v43, %v1161_v41  ;;  %v1089_v50 = vadd.f32 %v1088_v45, %v2530_v49  ;;  %v1167_v0 = vadd.f32 %v1166_v44, %v2528_v48 }
 0x16e   : > { %v1168_v51 = vpop.f32.mrf.mxu1  ;;  %v1090_v52 = vpop.f32.mrf.mxu0 }
 0x16f   : > { %1404 = vst [vmem:[%s2537_s7 + $0xd8] sm:$0xff] %v1756_v46  ;;  %v1741_v53 = vpack.c.bf16 %v1089_v50, %v1087_v47  ;;  %v1169_v54 = vadd.f32 %v1168_v51, %v2530_v49  ;;  %v1091_v57 = vadd.f32 %v1090_v52, %v2528_v48 }
 0x170   : > { %v1170_v55 = vpop.f32.mrf.mxu1  ;;  %v1092_v9 = vpop.f32.mrf.mxu0 }
 0x171   : > { %1389 = vst [vmem:[%s2537_s7 + $0x60] sm:$0xff] %v1741_v53  ;;  %v1757_v56 = vpack.c.bf16 %v1169_v54, %v1167_v0  ;;  %v1093_v58 = vadd.f32 %v1092_v9, %v2530_v49  ;;  %v1171_v60 = vadd.f32 %v1170_v55, %v2528_v48 }
 0x172   : > { %v1172_v17 = vpop.f32.mrf.mxu1  ;;  %v1096_v59 = vpop.f32.mrf.mxu0 }
 0x173   : > { %1405 = vst [vmem:[%s2537_s7 + $0xe0] sm:$0xff] %v1757_v56  ;;  %v1742_v61 = vpack.c.bf16 %v1093_v58, %v1091_v57  ;;  %v1173_v62 = vadd.f32 %v1172_v17, %v2530_v49  ;;  %v1097_v3 = vadd.f32 %v1096_v59, %v2528_v48 }
 0x174   : > { %v1176_v63 = vpop.f32.mrf.mxu1  ;;  %v1098_v1 = vpop.f32.mrf.mxu0 }
 0x175   : > { %1390 = vst [vmem:[%s2537_s7 + $0x68] sm:$0xff] %v1742_v61  ;;  %v1758_v2 = vpack.c.bf16 %v1173_v62, %v1171_v60  ;;  %v1099_v4 = vadd.f32 %v1098_v1, %v2530_v49  ;;  %v1177_v7 = vadd.f32 %v1176_v63, %v2528_v48 }
 0x176   : > { %v1178_v5 = vpop.f32.mrf.mxu1  ;;  %v1100_v6 = vpop.f32.mrf.mxu0 }
 0x177   : > { %1406 = vst [vmem:[%s2537_s7 + $0xe8] sm:$0xff] %v1758_v2  ;;  %v1743_v8 = vpack.c.bf16 %v1099_v4, %v1097_v3  ;;  %v1179_v24 = vadd.f32 %v1178_v5, %v2530_v49  ;;  %v1101_v14 = vadd.f32 %v1100_v6, %v2528_v48 }
 0x178   : > { %v1180_v10 = vpop.f32.mrf.mxu1  ;;  %v1102_v11 = vpop.f32.mrf.mxu0 }
 0x179   : > { %1391 = vst [vmem:[%s2537_s7 + $0x70] sm:$0xff] %v1743_v8  ;;  %v1759_v13 = vpack.c.bf16 %v1179_v24, %v1177_v7  ;;  %v1103_v25 = vadd.f32 %v1102_v11, %v2530_v49  ;;  %v1181_v16 = vadd.f32 %v1180_v10, %v2528_v48 }
 0x17a   : > { %v1182_v15 = vpop.f32.mrf.mxu1 }
 0x17b   : > { %1407 = vst [vmem:[%s2537_s7 + $0xf0] sm:$0xff] %v1759_v13  ;;  %v1744_v18 = vpack.c.bf16 %v1103_v25, %v1101_v14  ;;  %v1183_v19 = vadd.f32 %v1182_v15, %v2530_v49 }
 0x17d   : > { %1392 = vst [vmem:[%s2537_s7 + $0x78] sm:$0xff] %v1744_v18  ;;  %v1760_v20 = vpack.c.bf16 %v1183_v19, %v1181_v16 }
 0x17f   : > { %1408 = vst [vmem:[%s2537_s7 + $0xf8] sm:$0xff] %v1760_v20 }
 0x180   : > { %2158 = shalt.err (!%p2155_p11)
}
 0x181   : > { %s2159_s8 = scalar_lea.hbm %s2634_s26, 4096  ;;  %s2163_s25 = scalar_lea.hbm %s2690_s4, 8192 }
 0x182   : > { %p2160_p2 = scmp.ne.s32.totalorder %s2634_s26, %s2159_s8  ;;  %p2164_p12 = scmp.lt.s32.totalorder %s2634_s26, %s2690_s4 }
 0x183   : > { %p2165_p13 = scmp.lt.s32.totalorder %s2163_s25, %s2159_s8 }
 0x184   : > { %p2161_p6 = pnand %p2160_p2, %p2356_p0 }
 0x185   : > { %p2166_p3 = por %p2165_p13, %p2164_p12 }
 0x186   : > { %p2162_p9 = pneg %p2161_p6 }
 0x188   : > { %p2167_p1 = pnand %p2166_p3, %p2162_p9 }
 0x18a   : > { %2170 = shalt.err (!%p2167_p1)
}
 0x18b   : > { %s2243_s23 = smov 128   ;;  %s2244_s9 = smov 8  }
 0x18c   : > { %1881 = dma.vmem_to_hbm [thread:$0]  (%p2356_p0), %s2636_s6, 4096, %s2634_s26, %s1410_s18, %s2243_s23, %s2243_s23, %s2244_s9  }
 0x18d PF: > { %s1446_s7 = sand.u32 1, %s2213_s15   ;;  %p2711_p4 = scmp.ne.s32.totalorder %s2700_s24, 0 }
 0x18e   : > { %p2712_p8 = scmp.ge.s32.totalorder %s2233_s20, 2  ;;  %s1447_s2 = scalar_lea.sflag [#allocation5], %s1446_s7 }
 0x190   : > { %p1895_p10 = pnand %p2712_p8, %p2711_p4 }
 0x192   : > { %p1896_p5 = pneg %p1895_p10 }
 0x194   : > { %2208 = dma.done.wait (%p1896_p5), %s1447_s2, 4096  }
 0x195   : > { %2210 = vsyncadd (%p1896_p5), %s1447_s2, 4294963200  ;;  %s23_s20 = sadd.s32 1, %s2233_s20   ;;  %s2713_s18 = sld [smem:[#allocation14_spill]] }
 0x196   : > { %p20_p7 = scmp.ge.s32.totalorder %s23_s20, 4   ;;  %s2714_s19 = sld [smem:[#allocation15_spill]] }
 0x197   : > { %s2715_s15 = smov %s2217_s16  ;;  %s2716_s16 = smov %s2221_s17 }
 0x198   : > { %s2717_s17 = smov %s2365_s22  ;;  %22 = sbr.rel (!%p20_p7) target bundleno = 10 (0xa), region = 106 }
 0x19d   :  { %1452 = vsyncpa [#allocation4], 1 }
 0x19e   :  { %1454 = vsyncpa [#allocation4 + $0x1], 1 }
 0x19f   :  { %1455 = vsyncpa [#allocation7], 1 }
 0x1a0   :  { %1457 = vsyncpa [#allocation7 + $0x1], 1 }
 0x1a1   :  { %1458 = vsyncpa [#allocation5], 1 }
 0x1a2   :  { %1460 = vsyncpa [#allocation5 + $0x1], 1 }

</bundles_post_ra>
